<compile_context>
chip_gen: v6e
topology: v6e:2x2x1
jax: 0.10.0
libtpu: 0.0.40
codegen_flags: <defaults>
</compile_context>

<pallas_src>
import jax
import jax.numpy as jnp
from jax import lax
from jax.experimental import pallas as pl
from jax.experimental.pallas import tpu as pltpu

# ---------------- config (small demo shapes consistent with the module) -------------
BATCH = 2
NODE_NUM = 8
INPUT_DIM = 10
EMBED_DIM = 16          # "dim" in SDG.__init__
LEAKY_ALPHA = 0.2       # GAT alpha
BN_EPS = 1e-5

BN = BATCH * NODE_NUM   # total graph nodes per forward (16)
LP = 128                # lane width of each padded band / param block
W_ROWS = 16             # sublane rows reserved for the fused projection weight block
SLAB_COLS = 4 * LP      # 512: [lin | GAT.W | GAT1.W | folded attention vectors]
# slab row offsets (all blocks 8/16-row aligned)
R_W = 0                 # rows  0:16  fused weight (rows 0:F weights, row F = lin bias)
R_TH = 16               # rows 16:48  stacked adjacency thresholds [static ; dynamic]
R_ECONST = 48           # rows 48:64  constant attention-score term (emb_bn @ a_emb)
R_ESCALE = 64           # rows 64:80  tile(node_emb) * BN affine scale
R_VEC = 80              # rows 80:96  row 80 = BN shift (+1 marker), row 81 = out w (+b)
SLAB_ROWS = 96
NEG_INF = -9e15
BIG = 1e30


def _vmem():
    return pl.BlockSpec(memory_space=pltpu.MemorySpace.VMEM)


# ---------------------------------- fused kernel ------------------------------------
def _sdg_fused_kernel(x_ref, slab_ref, o_ref):
    f32 = jnp.float32

    # ---- ONE projection matmul: [lin(x) | h_s | h_d | e4 x-part] -------------------
    x2 = x_ref[...]                                                  # (BN, F)
    proj = (jnp.dot(x2, slab_ref[R_W:R_W + INPUT_DIM, :], preferred_element_type=f32)
            + slab_ref[R_W + INPUT_DIM:R_W + INPUT_DIM + 1, :])      # (BN, 512) + bias row

    emb_d = proj[:, 0:LP]                                            # lin(x)  (lanes 0:D)
    hstack = proj[:, LP:3 * LP]                                      # [h_s | h_d] (BN,256)
    e4 = proj[:, 3 * LP:4 * LP] + slab_ref[R_ECONST:R_ECONST + BN, 0:LP]
    # e4 lanes 0:4 = [e_src_s, e_dst_s, e_src_d, e_dst_d]; remaining lanes are zero.

    # ---- dynamic cos-sim graph; block mask + Gumbel pre-folded into thresholds -----
    # TODO(synk): cosin_sim helper is not in the reference source; standard
    # row-normalized X @ X^T is used (rsqrt goes to the EUP slot).
    en = emb_d * lax.rsqrt(jnp.sum(emb_d * emb_d, axis=-1, keepdims=True) + 1e-12)
    sim_d = lax.dot_general(en, en, (((1,), (1,)), ((), ())),
                            preferred_element_type=f32)              # (BN, BN)

    thresh = slab_ref[R_TH:R_TH + 2 * BN, 0:BN]                      # (2BN, BN)
    simval = jnp.concatenate([jnp.zeros((BN, BN), f32), 2.0 * sim_d - 1.0], axis=0)
    cond = simval >= thresh        # rows 0:BN  -> precomputed static adjacency (0 >= ∓BIG)
                                   # rows BN:2BN-> gumbel-hard dynamic pick, block-masked

    # ---- both GATs' scores + ONE fused softmax over the stacked (2BN, BN) tile -----
    # TODO(synk): the GAT class body is not in the reference source; standard GDN-style
    # graph attention is assumed (h = xW, scores from [h || node_emb] projections).
    e4t = e4[:, 0:4].T                                               # (4, BN), one transpose
    pre = jnp.concatenate([e4[:, 0:1] + e4t[1:2, :],                 # static scores
                           e4[:, 2:3] + e4t[3:4, :]], axis=0)        # dynamic scores
    s = jnp.where(pre > 0, pre, LEAKY_ALPHA * pre)                   # LeakyReLU(0.2)
    s = jnp.where(cond, s, NEG_INF)                                  # adjacency mask
    p = jnp.exp(s - jnp.max(s, axis=-1, keepdims=True))
    # approx reciprocal: ~1e-4 rel. error vs exact softmax; set approx=False for parity.
    attn = p * pl.reciprocal(jnp.sum(p, axis=-1, keepdims=True), approx=True)

    # ---- block-diagonal attn @ h as ONE matmul; pick the two diagonal blocks -------
    P = jnp.dot(attn, hstack, preferred_element_type=f32)            # (2BN, 256)
    emb = P[0:BN, 0:LP] + 0.01 * P[BN:2 * BN, LP:2 * LP]             # Emb_S + 0.01*Emb_D

    # ---- out stage: *node_emb, BN(eval)->affine, ReLU, Dropout(eval)=id, Linear ----
    # TODO(synk): eval-mode BatchNorm/Dropout semantics; training mode would use batch
    # statistics and stochastic dropout.
    yhat = jnp.maximum(emb * slab_ref[R_ESCALE:R_ESCALE + BN, 0:LP]
                       + slab_ref[R_VEC:R_VEC + 1, 0:LP], 0.0)       # lane D is a const 1
    z = jnp.sum(yhat * slab_ref[R_VEC + 1:R_VEC + 2, 0:LP],
                axis=-1, keepdims=True)                              # (BN,1) incl. out bias
    o_ref[...] = z.T                                                 # (1, BN) lane-row store


# ------------------------------- parameter init (plain JAX) -------------------------
def init_params(key):
    ks = jax.random.split(key, 8)
    D, F = EMBED_DIM, INPUT_DIM

    def lin_init(k, fan_in, fan_out):
        bound = 1.0 / jnp.sqrt(jnp.float32(fan_in))
        kw, kb = jax.random.split(k)
        w = jax.random.uniform(kw, (fan_in, fan_out), jnp.float32, -bound, bound)
        b = jax.random.uniform(kb, (1, fan_out), jnp.float32, -bound, bound)
        return w, b

    node_emb = jax.random.normal(ks[0], (NODE_NUM, D), jnp.float32)
    lin_w, lin_b = lin_init(ks[1], F, D)
    gat_w = 0.1 * jax.random.normal(ks[2], (F, D), jnp.float32)
    gat_a = 0.1 * jax.random.normal(ks[3], (4 * D, 1), jnp.float32)
    gat1_w = 0.1 * jax.random.normal(ks[4], (F, D), jnp.float32)
    gat1_a = 0.1 * jax.random.normal(ks[5], (4 * D, 1), jnp.float32)
    out_w, out_b = lin_init(ks[6], D, 1)

    # NOTE: self.tran / self.tran1 / self.GAT2 / topk are never used in SDG.forward.
    return dict(node_emb=node_emb, lin_w=lin_w, lin_b=lin_b,
                gat_w=gat_w, gat_a=gat_a, gat1_w=gat1_w, gat1_a=gat1_a,
                out_w=out_w, out_b=out_b,
                bn_gamma=jnp.ones((D,), jnp.float32), bn_beta=jnp.zeros((D,), jnp.float32),
                bn_mean=jnp.zeros((D,), jnp.float32), bn_var=jnp.ones((D,), jnp.float32))


def _cos_sim(v):
    vn = v * lax.rsqrt(jnp.sum(v * v, axis=-1, keepdims=True) + 1e-12)
    return vn @ vn.T


def build_slab(params, gs_diff, gd_diff):
    """Pack every parameter-only quantity (plus the fixed Gumbel draws) into ONE
    (SLAB_ROWS, SLAB_COLS) f32 slab so the kernel has exactly two inputs."""
    D, F, B, N = EMBED_DIM, INPUT_DIM, BATCH, NODE_NUM
    f32 = jnp.float32
    node_emb, gat_a, gat1_a = params['node_emb'], params['gat_a'], params['gat1_a']

    # band 3: fold the 4 attention-vector dots into the projection (x @ (W @ a_h)).
    e_w = jnp.concatenate([params['gat_w'] @ gat_a[0:D],   params['gat_w'] @ gat_a[2 * D:3 * D],
                           params['gat1_w'] @ gat1_a[0:D], params['gat1_w'] @ gat1_a[2 * D:3 * D]],
                          axis=1)                                     # (F, 4)

    def band(w, b=None):                                              # -> (W_ROWS, LP)
        blk = jnp.zeros((W_ROWS, LP), f32).at[:F, :w.shape[1]].set(w)
        if b is not None:
            blk = blk.at[F, :b.shape[-1]].set(b.reshape(-1))
        return blk

    w_aug = jnp.concatenate([band(params['lin_w'], params['lin_b']),
                             band(params['gat_w']), band(params['gat1_w']),
                             band(e_w)], axis=1)                      # (16, 512)

    # Static adjacency (parameter + fixed-noise only) folded into a threshold block;
    # block-diagonal mask + self-loops handled here, not in the kernel.
    blk_id = jnp.arange(B * N) // N
    same_block = blk_id[:, None] == blk_id[None, :]
    adj_s = ((2.0 * _cos_sim(node_emb) - 1.0) >= gs_diff) | jnp.eye(N, dtype=bool)
    static_allowed = same_block & jnp.tile(adj_s, (B, B))
    thresh_s = jnp.where(static_allowed, -BIG, BIG)                   # kernel compares 0 >= thr
    thresh_d = jnp.where(same_block, gd_diff, BIG)                    # off-block edges impossible
    thresh = jnp.concatenate([thresh_s, thresh_d], axis=0)            # (2BN, BN)

    # Constant part of the attention scores: emb_bn @ a_emb.
    emb_bn = jnp.tile(node_emb, (B, 1))                               # (BN, D)
    e_const = jnp.concatenate([emb_bn @ gat_a[D:2 * D],  emb_bn @ gat_a[3 * D:4 * D],
                               emb_bn @ gat1_a[D:2 * D], emb_bn @ gat1_a[3 * D:4 * D]],
                              axis=1)                                 # (BN, 4)

    # Eval-mode BatchNorm folded to affine; emb_bn pre-multiplied by the scale.
    scale = params['bn_gamma'] * lax.rsqrt(params['bn_var'] + BN_EPS)
    shift = params['bn_beta'] - params['bn_mean'] * scale
    emb_scale = emb_bn * scale[None, :]                               # (BN, D)

    # Lane D carries a constant-1 channel so the out-Linear bias folds into the reduce.
    shift_ext = jnp.zeros((LP,), f32).at[:D].set(shift).at[D].set(1.0)
    outw_ext = (jnp.zeros((LP,), f32).at[:D].set(params['out_w'].reshape(-1))
                .at[D].set(params['out_b'].reshape(())))

    def place(slab, row0, block):
        r, c = block.shape
        return slab.at[row0:row0 + r, :c].set(block)

    slab = jnp.zeros((SLAB_ROWS, SLAB_COLS), f32)
    slab = place(slab, R_W, w_aug)
    slab = place(slab, R_TH, thresh)
    slab = place(slab, R_ECONST, e_const)
    slab = place(slab, R_ESCALE, emb_scale)
    slab = place(slab, R_VEC, shift_ext[None, :])
    slab = place(slab, R_VEC + 1, outw_ext[None, :])
    return slab


@jax.jit
def sdg_forward(x, slab):
    b, n, f = x.shape
    x2 = x.reshape(b * n, f)
    out = pl.pallas_call(
        _sdg_fused_kernel,
        out_shape=jax.ShapeDtypeStruct((1, b * n), jnp.float32),
        in_specs=[_vmem(), _vmem()],
        out_specs=_vmem(),
        compiler_params=pltpu.CompilerParams(vmem_limit_bytes=2 * 1024 * 1024),
        cost_estimate=pl.CostEstimate(
            flops=520_000, transcendentals=576,
            bytes_accessed=SLAB_ROWS * SLAB_COLS * 4 + b * n * f * 4 + b * n * 4),
    )(x2, slab)
    return out.reshape(b, n)                                          # == out.view(-1, node_num)


if __name__ == "__main__":
    key = jax.random.PRNGKey(0)
    k_x, k_p, k_gs, k_gd = jax.random.split(key, 4)

    x = jax.random.normal(k_x, (BATCH, NODE_NUM, INPUT_DIM), jnp.float32)
    params = init_params(k_p)

    # TODO(synk): F.gumbel_softmax is stochastic; Gumbel noise is drawn once from a fixed
    # JAX key (only g1-g0 matters for the hard channel-0 pick) and folded into the
    # adjacency thresholds inside the parameter slab, matching "gumbel then repeat/mask".
    gs = jax.random.gumbel(k_gs, (2, NODE_NUM, NODE_NUM), jnp.float32)
    gd = jax.random.gumbel(k_gd, (2, BATCH * NODE_NUM, BATCH * NODE_NUM), jnp.float32)
    slab = jax.block_until_ready(build_slab(params, gs[1] - gs[0], gd[1] - gd[0]))

    out = sdg_forward(x, slab)
    jax.block_until_ready(out)
    assert out.shape == (BATCH, NODE_NUM) and out.dtype == jnp.float32
    print("KERNEL_OK")
</pallas_src>

<mosaic_0001>
module attributes {stable_mosaic.version = 11 : i64} {
  func.func @_sdg_fused_kernel(%arg0: memref<16x10xf32, #tpu.memory_space<vmem>>, %arg1: memref<96x512xf32, #tpu.memory_space<vmem>>, %arg2: memref<1x16xf32, #tpu.memory_space<vmem>>) attributes {dimension_semantics = [], scalar_prefetch = 0 : i64, scratch_operands = 0 : i64, tpu.core_type = #tpu.core_type<tc>} {
    %c0 = arith.constant 0 : index
    %c0_0 = arith.constant 0 : index
    %0 = vector.load %arg0[%c0, %c0_0] : memref<16x10xf32, #tpu.memory_space<vmem>>, vector<16x10xf32>
    %c0_1 = arith.constant 0 : index
    %c0_2 = arith.constant 0 : index
    %1 = vector.load %arg1[%c0_1, %c0_2] : memref<96x512xf32, #tpu.memory_space<vmem>>, vector<10x512xf32>
    %cst = arith.constant dense<0.000000e+00> : vector<16x512xf32>
    %2 = tpu.matmul %0, %1, %cst {dimension_numbers = #tpu.dot_dimension_numbers<[1], [0], [0], [1], [0, 0, 1, 1], [], []>} : vector<16x10xf32>, vector<10x512xf32>, vector<16x512xf32> -> vector<16x512xf32>
    %c10 = arith.constant 10 : index
    %c0_3 = arith.constant 0 : index
    %3 = vector.load %arg1[%c10, %c0_3] : memref<96x512xf32, #tpu.memory_space<vmem>>, vector<1x512xf32>
    %4 = vector.broadcast %3 : vector<1x512xf32> to vector<16x512xf32>
    %5 = arith.addf %2, %4 : vector<16x512xf32>
    %6 = vector.extract_strided_slice %5 {offsets = [0, 0], sizes = [16, 128], strides = [1, 1]} : vector<16x512xf32> to vector<16x128xf32>
    %7 = vector.extract_strided_slice %5 {offsets = [0, 128], sizes = [16, 256], strides = [1, 1]} : vector<16x512xf32> to vector<16x256xf32>
    %8 = vector.extract_strided_slice %5 {offsets = [0, 384], sizes = [16, 128], strides = [1, 1]} : vector<16x512xf32> to vector<16x128xf32>
    %c48 = arith.constant 48 : index
    %c0_4 = arith.constant 0 : index
    %9 = vector.load %arg1[%c48, %c0_4] : memref<96x512xf32, #tpu.memory_space<vmem>>, vector<16x128xf32>
    %10 = arith.addf %8, %9 : vector<16x128xf32>
    %11 = arith.mulf %6, %6 : vector<16x128xf32>
    %cst_5 = arith.constant dense<0.000000e+00> : vector<16xf32>
    %12 = vector.multi_reduction <add>, %11, %cst_5 [1] : vector<16x128xf32> to vector<16xf32>
    %13 = vector.shape_cast %12 : vector<16xf32> to vector<16x1xf32>
    %cst_6 = arith.constant 9.99999996E-13 : f32
    %14 = vector.broadcast %cst_6 : f32 to vector<16x1xf32>
    %15 = arith.addf %13, %14 : vector<16x1xf32>
    %16 = math.rsqrt %15 : vector<16x1xf32>
    %17 = vector.broadcast %16 : vector<16x1xf32> to vector<16x128xf32>
    %18 = arith.mulf %6, %17 : vector<16x128xf32>
    %cst_7 = arith.constant dense<0.000000e+00> : vector<16x16xf32>
    %19 = tpu.matmul %18, %18, %cst_7 {dimension_numbers = #tpu.dot_dimension_numbers<[1], [1], [0], [0], [0, 0, 1, 0], [], []>} : vector<16x128xf32>, vector<16x128xf32>, vector<16x16xf32> -> vector<16x16xf32>
    %c16 = arith.constant 16 : index
    %c0_8 = arith.constant 0 : index
    %20 = vector.load %arg1[%c16, %c0_8] : memref<96x512xf32, #tpu.memory_space<vmem>>, vector<32x16xf32>
    %cst_9 = arith.constant 0.000000e+00 : f32
    %21 = vector.broadcast %cst_9 : f32 to vector<16x16xf32>
    %cst_10 = arith.constant 2.000000e+00 : f32
    %22 = vector.broadcast %cst_10 : f32 to vector<16x16xf32>
    %23 = arith.mulf %22, %19 : vector<16x16xf32>
    %cst_11 = arith.constant 1.000000e+00 : f32
    %24 = vector.broadcast %cst_11 : f32 to vector<16x16xf32>
    %25 = arith.subf %23, %24 : vector<16x16xf32>
    %26 = tpu.concatenate %21, %25 in 0 : vector<16x16xf32>, vector<16x16xf32> -> vector<32x16xf32>
    %27 = arith.cmpf oge, %26, %20 : vector<32x16xf32>
    %28 = vector.extract_strided_slice %10 {offsets = [0, 0], sizes = [16, 4], strides = [1, 1]} : vector<16x128xf32> to vector<16x4xf32>
    %29 = tpu.transpose %28, [1, 0] : vector<16x4xf32> -> vector<4x16xf32>
    %30 = vector.extract_strided_slice %10 {offsets = [0, 0], sizes = [16, 1], strides = [1, 1]} : vector<16x128xf32> to vector<16x1xf32>
    %31 = vector.extract_strided_slice %29 {offsets = [1, 0], sizes = [1, 16], strides = [1, 1]} : vector<4x16xf32> to vector<1x16xf32>
    %32 = vector.broadcast %30 : vector<16x1xf32> to vector<16x16xf32>
    %33 = vector.broadcast %31 : vector<1x16xf32> to vector<16x16xf32>
    %34 = arith.addf %32, %33 : vector<16x16xf32>
    %35 = vector.extract_strided_slice %10 {offsets = [0, 2], sizes = [16, 1], strides = [1, 1]} : vector<16x128xf32> to vector<16x1xf32>
    %36 = vector.extract_strided_slice %29 {offsets = [3, 0], sizes = [1, 16], strides = [1, 1]} : vector<4x16xf32> to vector<1x16xf32>
    %37 = vector.broadcast %35 : vector<16x1xf32> to vector<16x16xf32>
    %38 = vector.broadcast %36 : vector<1x16xf32> to vector<16x16xf32>
    %39 = arith.addf %37, %38 : vector<16x16xf32>
    %40 = tpu.concatenate %34, %39 in 0 : vector<16x16xf32>, vector<16x16xf32> -> vector<32x16xf32>
    %cst_12 = arith.constant 0.000000e+00 : f32
    %41 = vector.broadcast %cst_12 : f32 to vector<32x16xf32>
    %42 = arith.cmpf ogt, %40, %41 : vector<32x16xf32>
    %cst_13 = arith.constant 2.000000e-01 : f32
    %43 = vector.broadcast %cst_13 : f32 to vector<32x16xf32>
    %44 = arith.mulf %43, %40 : vector<32x16xf32>
    %45 = arith.select %42, %40, %44 : vector<32x16xi1>, vector<32x16xf32>
    %cst_14 = arith.constant -9.000000e+15 : f32
    %46 = vector.broadcast %cst_14 : f32 to vector<32x16xf32>
    %47 = arith.select %27, %45, %46 : vector<32x16xi1>, vector<32x16xf32>
    %cst_15 = arith.constant dense<0xFF800000> : vector<32xf32>
    %48 = vector.multi_reduction <maximumf>, %47, %cst_15 [1] : vector<32x16xf32> to vector<32xf32>
    %49 = vector.shape_cast %48 : vector<32xf32> to vector<32x1xf32>
    %50 = vector.broadcast %49 : vector<32x1xf32> to vector<32x16xf32>
    %51 = arith.subf %47, %50 : vector<32x16xf32>
    %52 = math.exp %51 : vector<32x16xf32>
    %cst_16 = arith.constant dense<0.000000e+00> : vector<32xf32>
    %53 = vector.multi_reduction <add>, %52, %cst_16 [1] : vector<32x16xf32> to vector<32xf32>
    %54 = vector.shape_cast %53 : vector<32xf32> to vector<32x1xf32>
    %55 = tpu.reciprocal %54 {approx = true} : vector<32x1xf32> -> vector<32x1xf32>
    %56 = vector.broadcast %55 : vector<32x1xf32> to vector<32x16xf32>
    %57 = arith.mulf %52, %56 : vector<32x16xf32>
    %cst_17 = arith.constant dense<0.000000e+00> : vector<32x256xf32>
    %58 = tpu.matmul %57, %7, %cst_17 {dimension_numbers = #tpu.dot_dimension_numbers<[1], [0], [0], [1], [0, 0, 1, 1], [], []>} : vector<32x16xf32>, vector<16x256xf32>, vector<32x256xf32> -> vector<32x256xf32>
    %59 = vector.extract_strided_slice %58 {offsets = [0, 0], sizes = [16, 128], strides = [1, 1]} : vector<32x256xf32> to vector<16x128xf32>
    %60 = vector.extract_strided_slice %58 {offsets = [16, 128], sizes = [16, 128], strides = [1, 1]} : vector<32x256xf32> to vector<16x128xf32>
    %cst_18 = arith.constant 0.00999999977 : f32
    %61 = vector.broadcast %cst_18 : f32 to vector<16x128xf32>
    %62 = arith.mulf %61, %60 : vector<16x128xf32>
    %63 = arith.addf %59, %62 : vector<16x128xf32>
    %c64 = arith.constant 64 : index
    %c0_19 = arith.constant 0 : index
    %64 = vector.load %arg1[%c64, %c0_19] : memref<96x512xf32, #tpu.memory_space<vmem>>, vector<16x128xf32>
    %65 = arith.mulf %63, %64 : vector<16x128xf32>
    %c80 = arith.constant 80 : index
    %c0_20 = arith.constant 0 : index
    %66 = vector.load %arg1[%c80, %c0_20] : memref<96x512xf32, #tpu.memory_space<vmem>>, vector<1x128xf32>
    %67 = vector.broadcast %66 : vector<1x128xf32> to vector<16x128xf32>
    %68 = arith.addf %65, %67 : vector<16x128xf32>
    %cst_21 = arith.constant 0.000000e+00 : f32
    %69 = vector.broadcast %cst_21 : f32 to vector<16x128xf32>
    %70 = arith.maximumf %68, %69 : vector<16x128xf32>
    %c81 = arith.constant 81 : index
    %c0_22 = arith.constant 0 : index
    %71 = vector.load %arg1[%c81, %c0_22] : memref<96x512xf32, #tpu.memory_space<vmem>>, vector<1x128xf32>
    %72 = vector.broadcast %71 : vector<1x128xf32> to vector<16x128xf32>
    %73 = arith.mulf %70, %72 : vector<16x128xf32>
    %cst_23 = arith.constant dense<0.000000e+00> : vector<16xf32>
    %74 = vector.multi_reduction <add>, %73, %cst_23 [1] : vector<16x128xf32> to vector<16xf32>
    %75 = vector.shape_cast %74 : vector<16xf32> to vector<16x1xf32>
    %76 = tpu.transpose %75, [1, 0] : vector<16x1xf32> -> vector<1x16xf32>
    %c0_24 = arith.constant 0 : index
    %c0_25 = arith.constant 0 : index
    %77 = vector.load %arg2[%c0_24, %c0_25] : memref<1x16xf32, #tpu.memory_space<vmem>>, vector<1x16xf32>
    tpu.vector_store %arg2[%c0_24, %c0_25], %76 {strides = array<i32>} : memref<1x16xf32, #tpu.memory_space<vmem>>, vector<1x16xf32>,
    return
  }
}

</mosaic_0001>

<bundles_post_ra>
// kernel: sdg_forward.1
= control target key start
LH: loop header
LB: loop body
LE: loop exit
PB: predicated region body
PF: predicated region fallthrough
CT: control target
= control target key end

     0   :  { %7 = vsyncpa [#allocation3], 0  ;;  %s803_s0 = inlined_call_operand.hbm [shape: f32[16,10], index: 0, kind: input, shape index: {}]   ;;  %s804_s1 = inlined_call_operand.hbm [shape: f32[96,512], index: 1, kind: input, shape index: {}]   ;;  %s805_s2 = inlined_call_operand.vmem [shape: f32[1,16], index: 2, kind: output, shape index: {}]  }
   0x1   :  { %8 = vsyncpa [#allocation5], 0  ;;  %s732_s9 = smov [#allocation2]  }
   0x2   :  { %s14_s10 = sshll.u32 %s732_s9, 4  ;;  %s15_s10 = int_to_ptr.vmem [resolvable:$true] %s14_s10 }
   0x3   :  { %s696_s11 = scalar_lea.vmem %s15_s10, 256  ;;  %p701_p1 = scmp.lt.s32.totalorder %s15_s10, %s15_s10 }
   0x4   :  { %p697_p0 = scmp.ne.s32.totalorder %s15_s10, %s696_s11  ;;  %p702_p2 = scmp.lt.s32.totalorder %s696_s11, %s696_s11 }
   0x6   :  { %p703_p3 = por %p702_p2, %p701_p1 }
   0x8   :  { %p704_p4 = pnand %p703_p3, %p697_p0 }
   0xa   :  { %707 = shalt.err (!%p704_p4)
}
   0xb   :  { %s733_s12 = smov 128   ;;  %s734_s13 = smov 8  }
   0xc   :  { %20 = dma.hbm_to_vmem [thread:$0]  %s803_s0, 256, %s15_s10, [#allocation3], %s733_s12, %s733_s12, %s734_s13  }
   0xd   :  { %s735_s16 = smov [#allocation4]  }
   0xe   :  { %s26_s17 = sshll.u32 %s735_s16, 4  ;;  %s27_s17 = int_to_ptr.vmem [resolvable:$true] %s26_s17 }
   0xf   :  { %s716_s18 = scalar_lea.vmem %s27_s17, 6144  ;;  %p721_p6 = scmp.lt.s32.totalorder %s27_s17, %s27_s17 }
  0x10   :  { %p717_p5 = scmp.ne.s32.totalorder %s27_s17, %s716_s18  ;;  %p722_p7 = scmp.lt.s32.totalorder %s716_s18, %s716_s18 }
  0x12   :  { %p723_p8 = por %p722_p7, %p721_p6 }
  0x14   :  { %p724_p9 = pnand %p723_p8, %p717_p5 }
  0x16   :  { %727 = shalt.err (!%p724_p9)
}
  0x17   :  { %s736_s19 = smov 512   ;;  %s737_s20 = smov 32  }
  0x18   :  { %32 = dma.hbm_to_vmem [thread:$0]  %s804_s1, 6144, %s27_s17, [#allocation5], %s736_s19, %s736_s19, %s737_s20  }
  0x19   :  { %728 = dma.done.wait [#allocation3], 256  }
  0x1a   :  { %729 = vsyncadd [#allocation3], 4294967040 }
  0x1b   :  { %730 = dma.done.wait [#allocation5], 6144  }
  0x1c   :  { %731 = vsyncadd [#allocation5], 4294961152  ;;  %v738_v0 = vmov 0.0   ;;  %vm79_vm0 = vcmask 1041408   ;;  %v46_v1 = vld [vmem:[#allocation4 + $0x28] sm:$0x3]  ;;  %v52_v13 = vlaneseq }
  0x1d   :  { %156 = vmatprep.mubr.f32.mxu0 %v738_v0  ;;  %548 = vmatprep.mubr.f32.mxu1 %v738_v0  ;;  %v45_v2 = vld [vmem:[#allocation4 + $0x20] sm:$0x3]  ;;  %v42_v3 = vld [vmem:[#allocation4 + $0x8] sm:$0xff]  ;;  %v39_v5 = vld [vmem:[#allocation2] sm:$0xff]  ;;  %vm72_vm1 = vcmask 80896   ;;  %v739_v11 = vmov 0  }
  0x1e   :  { %629 = vmatprep.subr.msk.mxu0 %vm79_vm0, %v46_v1  ;;  %v41_v4 = vld [vmem:[#allocation4] sm:$0xff]  ;;  %v48_v6 = vld [vmem:[#allocation4 + $0x38] sm:$0x3]  ;;  %v47_v7 = vld [vmem:[#allocation4 + $0x30] sm:$0x3]  ;;  %665 = vset.pattern.permute.xlu1 %v739_v11  ;;  %v740_v12 = vmov 2  }
  0x1f   :  { %630 = vmatpush1.msk.msra.mxu0 %vm79_vm0, %v45_v2  ;;  %v44_v8 = vld [vmem:[#allocation4 + $0x18] sm:$0xff]  ;;  %v43_v9 = vld [vmem:[#allocation4 + $0x10] sm:$0xff]  ;;  %666 = vset.pattern.permute.xlu0 %v740_v12  ;;  %v775_v14 = vshrl.u32 %v52_v13, 7  ;;  %v246_v32 = vld [vmem:[#allocation4 + $0xc0] sm:$0xff]  ;;  %vm427_vm6 = vcmask 130048   ;;  %vm621_vm11 = vcmask 122880  }
  0x20   :  { %122 = vmatprep.subr.mxu0 %v42_v3  ;;  %v40_v10 = vld [vmem:[#allocation2 + $0x8] sm:$0xff]  ;;  %v247_v42 = vld [vmem:[#allocation4 + $0xe0] sm:$0xff] }
  0x21   :  { %123 = vmatpush1.msra.mxu0 %v41_v4  ;;  %v54_v15 = vsub.s32 0, %v775_v14  ;;  %v50_v16 = vld [vmem:[#allocation4 + $0x22] ss:$8 sm:$0xf]  ;;  %v66_v20 = vsub.s32 3, %v775_v14  ;;  %v62_v23 = vsub.s32 2, %v775_v14 }
  0x22   :  { %631 = vmatmul.mubr.msk.f32.vlgmr.msra.gmra.mxu0 %vm72_vm1, %v39_v5  ;;  %633 = vmatprep.subr.msk.mxu0 %vm79_vm0, %v48_v6  ;;  %v58_v28 = vsub.s32 1, %v775_v14  ;;  %v338_v59 = vld [vmem:[#allocation4 + $0x60] sm:$0xff] }
  0x23   :  { %162 = vmatprep.mubr.f32.mxu0 %v738_v0  ;;  %634 = vmatpush1.msk.msra.mxu0 %vm79_vm0, %v47_v7  ;;  %v55_v19 = vrot.slane %v50_v16, %v54_v15  ;;  %v67_v27 = vrot.slane %v50_v16, %v66_v20  ;;  %v63_v30 = vrot.slane %v50_v16, %v62_v23  ;;  %v337_v60 = vld [vmem:[#allocation4 + $0x40] sm:$0xff]  ;;  %vm640_vm2 = vcmp.le.f32.partialorder %v338_v59, 0.0 }
  0x24   :  { %199 = vmatprep.subr.mxu0 %v44_v8  ;;  %v59_v35 = vrot.slane %v50_v16, %v58_v28  ;;  %vm639_vm3 = vcmp.le.f32.partialorder %v337_v60, 0.0 }
  0x25   :  { %200 = vmatpush1.msra.mxu0 %v43_v9 }
  0x26   :  { %632 = vmatmul.mubr.msk.f32.gmra.mxu0 %vm72_vm1, %v40_v10 }
  0x27   :  { %233 = vmatprep.mubr.f32.mxu0 %v738_v0 }
  0x2a   :  { %635 = vmatmul.mubr.msk.f32.vlgmr.msra.gmra.mxu0 %vm72_vm1, %v39_v5 }
  0x2b   :  { %239 = vmatprep.mubr.f32.mxu0 %v738_v0 }
  0x2e   :  { %636 = vmatmul.mubr.msk.f32.gmra.mxu0 %vm72_vm1, %v40_v10 }
  0xe2   :  { %v158_v17 = vpop.f32.mrf.mxu0 }
  0xe3   :  { %v159_v25 = vadd.f32 %v158_v17, %v55_v19 }
  0xe4   :  { %v160_v18 = vpop.f32.mrf.mxu0 }
  0xe5   :  { %v250_v34 = vmul.f32 %v159_v25, %v159_v25  ;;  %v161_v44 = vadd.f32 %v160_v18, %v59_v35 }
  0xe6   :  { %v164_v21 = vpop.f32.mrf.mxu0 }
  0xe7   :  { %v165_v22 = vadd.f32 %v164_v21, %v55_v19 }
  0xe8   :  { %v166_v24 = vpop.f32.mrf.mxu0 }
  0xe9   :  { %v251_v26 = vmul.f32 %v165_v22, %v165_v22  ;;  %v167_v40 = vadd.f32 %v166_v24, %v59_v35 }
  0xea   :  { %v235_v29 = vpop.f32.mrf.mxu0 }
  0xeb   :  { %254 = vadd.xlane.f32.xlu0 %v251_v26  ;;  %v236_v37 = vadd.f32 %v235_v29, %v63_v30  ;;  %v339_v26 = vld [vmem:[#allocation4 + $0x80] sm:$0xff] }
  0xec   :  { %v237_v31 = vpop.f32.mrf.mxu0 }
  0xed   :  { %v238_v33 = vadd.f32 %v237_v31, %v67_v27 }
  0xee   :  { %v241_v36 = vpop.f32.mrf.mxu0 }
  0xef   :  { %v248_v38 = vadd.f32 %v246_v32, %v238_v33  ;;  %252 = vadd.xlane.f32.xlu0 %v250_v34  ;;  %v242_v39 = vadd.f32 %v241_v36, %v63_v30 }
  0xf0   :  { %v243_v41 = vpop.f32.mrf.mxu0 }
  0xf1   :  { %v244_v43 = vadd.f32 %v243_v41, %v67_v27  ;;  %512 = vmatprep.subr.mxu1 %v242_v39  ;;  %383 = vperm.xlu1 %665, %v248_v38   ;;  %v340_v27 = vld [vmem:[#allocation4 + $0xa0] sm:$0xff] }
  0xf2   :  { %513 = vmatpush1.msra.mxu1 %v167_v40 }
  0xf3   :  { %v249_v45 = vadd.f32 %v247_v42, %v244_v43  ;;  %514 = vmatprep.subr.mxu1 %v236_v37 }
  0xf4   :  { %515 = vmatpush1.msra.mxu1 %v161_v44 }
  0xf5   :  { %388 = vperm.xlu1 %665, %v249_v45  }
  0xf9   :  { %667 = vset.pattern.permute.xlu1 %v740_v12 }
  0xfa   :  { %402 = vperm.xlu1 %667, %v249_v45  }
 0x105   :  { %398 = vperm.xlu0 %666, %v248_v38  }
 0x123   :  { %349 = vxpose.xlu1.b32.start [1/2] (short) (narrow) %v248_v38, 8 }
 0x127   :  { %350 = vxpose.xlu1.b32.end [2/2] (short) (narrow) %v249_v45, 8 }
 0x16c   :  { %v384_v54 = vpop.permute.xlu1 %383 }
 0x170   :  { %v389_v55 = vpop.permute.xlu1 %388 }
 0x174   :  { %v255_v46 = vpop.xlane.xlu0 %254 }
 0x175   :  { %v257_v47 = vadd.f32 1e-12, %v255_v46  ;;  %v403_v56 = vpop.permute.xlu1 %402 }
 0x177   :  { %668 = vrsqrt.f32 %v257_v47 }
 0x178   :  { %v253_v48 = vpop.xlane.xlu0 %252 }
 0x179   :  { %v256_v49 = vadd.f32 1e-12, %v253_v48 }
 0x17b   :  { %670 = vrsqrt.f32 %v256_v49 }
 0x180   :  { %v399_v8 = vpop.permute.xlu0 %398 }
 0x184   :  { %v669_v50 = vpop.eup %668 }
 0x185   :  { %v261_v51 = vmul.f32 %v669_v50, %v165_v22 }
 0x187   :  { %649 = vmatprep.subr.mxu0 %v261_v51 }
 0x188   :  { %v671_v52 = vpop.eup %670  ;;  %650 = vmatpush3.xpose.msra.mxu0 %v261_v51 }
 0x189   :  { %v260_v53 = vmul.f32 %v671_v52, %v159_v25 }
 0x18b   :  { %651 = vmatprep.subr.mxu0 %v260_v53  ;;  %653 = vmatprep.mubr.f32.mxu0 %v260_v53 }
 0x18c   :  { %652 = vmatpush3.xpose.msra.mxu0 %v260_v53 }
 0x18f   :  { %654 = vmatmul.mubr.f32.vlgmr.msra.gmra.mxu0 %v261_v51 }
 0x19f   :  { %v365_v57 = vpop.trf.xlu1 }
 0x1a0   :  { %v394_v58 = vrot.slane %v365_v57, %v58_v28  ;;  %v408_v12 = vrot.slane %v365_v57, %v66_v20 }
 0x1a2   :  { %v395_v61 = vadd.f32 %v394_v58, %v384_v54  ;;  %v396_v62 = vadd.f32 %v394_v58, %v389_v55  ;;  %v409_v16 = vadd.f32 %v408_v12, %v399_v8  ;;  %v410_v18 = vadd.f32 %v408_v12, %v403_v56  ;;  %v577_v8 = vld [vmem:[#allocation4 + $0x140] ss:$0 sm:$0xff] }
 0x1a4   :  { %vm412_vm4 = vcmp.gt.f32.partialorder %v396_v62, 0.0  ;;  %v416_v63 = vmul.f32 0.2, %v396_v62  ;;  %vm411_vm5 = vcmp.gt.f32.partialorder %v395_v61, 0.0  ;;  %v415_v1 = vmul.f32 0.2, %v395_v61 }
 0x1a5   :  { %v417_v23 = vmul.f32 0.2, %v409_v16  ;;  %vm413_vm7 = vcmp.gt.f32.partialorder %v409_v16, 0.0  ;;  %v418_v29 = vmul.f32 0.2, %v410_v18  ;;  %vm414_vm8 = vcmp.gt.f32.partialorder %v410_v18, 0.0 }
 0x1a6   :  { %v420_v2 = vsel %vm412_vm4, %v396_v62, %v416_v63  ;;  %v419_v3 = vsel %vm411_vm5, %v395_v61, %v415_v1 }
 0x1a7   :  { %v424_v4 = vsel %vm640_vm2, %v420_v2, -9e+15  ;;  %v423_v5 = vsel %vm639_vm3, %v419_v3, -9e+15  ;;  %v421_v14 = vsel %vm413_vm7, %v409_v16, %v417_v23  ;;  %v422_v31 = vsel %vm414_vm8, %v410_v18, %v418_v29 }
 0x1a8   :  { %v431_v6 = vsel %vm427_vm6, %v424_v4, -inf  ;;  %v428_v7 = vsel %vm427_vm6, %v423_v5, -inf }
 0x1a9   :  { %432 = vmax.xlane.f32.xlu1 %v431_v6  ;;  %429 = vmax.xlane.f32.xlu0 %v428_v7 }
 0x232   :  { %v430_v9 = vpop.xlane.xlu0 %429  ;;  %v433_v11 = vpop.xlane.xlu1 %432 }
 0x233   :  { %v440_v10 = vsub.f32 %v423_v5, %v430_v9  ;;  %v441_v13 = vsub.f32 %v424_v4, %v433_v11  ;;  %v573_v4 = vld [vmem:[#allocation4 + $0x100] sm:$0xff] }
 0x234   :  { %v574_v11 = vld [vmem:[#allocation4 + $0x120] sm:$0xff] }
 0x235   :  { %v444_v15 = vmul.f32 1.442695, %v440_v10  ;;  %v446_v19 = vmul.f32 1.442695, %v441_v13  ;;  %v582_v13 = vld [vmem:[#allocation4 + $0x141] ss:$0 sm:$0xff] }
 0x237   :  { %672 = vpow2.f32 %v444_v15 }
 0x238   :  { %674 = vpow2.f32 %v446_v19 }
 0x244   :  { %v673_v34 = vpop.eup %672 }
 0x245   :  { %v452_v35 = vsel %vm427_vm6, %v673_v34, 0.0  ;;  %v675_v36 = vpop.eup %674 }
 0x246   :  { %v455_v37 = vsel %vm427_vm6, %v675_v36, 0.0 }
 0x24f   :  { %v655_v17 = vpop.f32.mrf.mxu0 }
 0x250   :  { %v342_v21 = vmul.f32 2.0, %v655_v17 }
 0x251   :  { %v328_v22 = vpop.f32.mrf.mxu0 }
 0x252   :  { %v638_v24 = vadd.f32 -1.0, %v342_v21  ;;  %v341_v25 = vmul.f32 2.0, %v328_v22 }
 0x254   :  { %v637_v28 = vadd.f32 -1.0, %v341_v25  ;;  %vm348_vm10 = vcmp.ge.f32.partialorder %v638_v24, %v340_v27 }
 0x255   :  { %v426_v32 = vsel %vm348_vm10, %v422_v31, -9e+15 }
 0x256   :  { %vm347_vm9 = vcmp.ge.f32.partialorder %v637_v28, %v339_v26  ;;  %v437_v33 = vsel %vm427_vm6, %v426_v32, -inf }
 0x257   :  { %v425_v20 = vsel %vm347_vm9, %v421_v14, -9e+15 }
 0x258   :  { %v434_v30 = vsel %vm427_vm6, %v425_v20, -inf }
 0x259   :  { %435 = vmax.xlane.f32.xlu0 %v434_v30 }
 0x25d   :  { %438 = vmax.xlane.f32.xlu0 %v437_v33 }
 0x261   :  { %453 = vadd.xlane.f32.xlu0 %v452_v35 }
 0x265   :  { %456 = vadd.xlane.f32.xlu0 %v455_v37 }
 0x2e2   :  { %v436_v38 = vpop.xlane.xlu0 %435 }
 0x2e3   :  { %v442_v39 = vsub.f32 %v425_v20, %v436_v38 }
 0x2e5   :  { %v448_v40 = vmul.f32 1.442695, %v442_v39 }
 0x2e6   :  { %v439_v41 = vpop.xlane.xlu0 %438 }
 0x2e7   :  { %676 = vpow2.f32 %v448_v40  ;;  %v443_v42 = vsub.f32 %v426_v32, %v439_v41 }
 0x2e9   :  { %v450_v43 = vmul.f32 1.442695, %v443_v42 }
 0x2ea   :  { %v454_v44 = vpop.xlane.xlu0 %453 }
 0x2eb   :  { %678 = vpow2.f32 %v450_v43 }
 0x2ec   :  { %680 = vrcp.f32 %v454_v44 }
 0x2ee   :  { %v457_v45 = vpop.xlane.xlu0 %456 }
 0x2ef   :  { %682 = vrcp.f32 %v457_v45 }
 0x2f4   :  { %v677_v46 = vpop.eup %676 }
 0x2f5   :  { %v458_v47 = vsel %vm427_vm6, %v677_v46, 0.0 }
 0x2f6   :  { %459 = vadd.xlane.f32.xlu1 %v458_v47 }
 0x2f8   :  { %v679_v48 = vpop.eup %678 }
 0x2f9   :  { %v681_v49 = vpop.eup %680  ;;  %v461_v50 = vsel %vm427_vm6, %v679_v48, 0.0 }
 0x2fa   :  { %462 = vadd.xlane.f32.xlu0 %v461_v50  ;;  %v468_v51 = vmul.f32 %v681_v49, %v673_v34 }
 0x2fc   :  { %v683_v52 = vpop.eup %682  ;;  %641 = vmatmul.mubr.msk.f32.vlgmr.msra.gmra.mxu1 %vm427_vm6, %v468_v51 }
 0x2fd   :  { %553 = vmatprep.mubr.f32.mxu1 %v738_v0  ;;  %v469_v53 = vmul.f32 %v683_v52, %v675_v36 }
 0x300   :  { %642 = vmatmul.mubr.msk.f32.gmra.mxu1 %vm427_vm6, %v469_v53 }
 0x301   :  { %558 = vmatprep.mubr.f32.mxu1 %v738_v0 }
 0x37f   :  { %v460_v54 = vpop.xlane.xlu1 %459 }
 0x380   :  { %684 = vrcp.f32 %v460_v54 }
 0x383   :  { %v463_v55 = vpop.xlane.xlu0 %462 }
 0x384   :  { %686 = vrcp.f32 %v463_v55 }
 0x38d   :  { %v685_v56 = vpop.eup %684 }
 0x38e   :  { %v470_v57 = vmul.f32 %v685_v56, %v677_v46 }
 0x390   :  { %643 = vmatmul.mubr.msk.f32.gmra.mxu1 %vm427_vm6, %v470_v57 }
 0x391   :  { %v687_v58 = vpop.eup %686  ;;  %563 = vmatprep.mubr.f32.mxu1 %v738_v0 }
 0x392   :  { %v471_v59 = vmul.f32 %v687_v58, %v679_v48 }
 0x394   :  { %644 = vmatmul.mubr.msk.f32.gmra.mxu1 %vm427_vm6, %v471_v59 }
 0x3bc   :  { %v550_v60 = vpop.f32.mrf.mxu1 }
 0x3be   :  { %v552_v61 = vpop.f32.mrf.mxu1 }
 0x3c0   :  { %v555_v62 = vpop.f32.mrf.mxu1 }
 0x3c2   :  { %v557_v63 = vpop.f32.mrf.mxu1 }
 0x450   :  { %v560_v1 = vpop.f32.mrf.mxu1 }
 0x452   :  { %v561_v2 = vpop.f32.mrf.mxu1 }
 0x453   :  { %v569_v3 = vmul.f32 0.01, %v561_v2 }
 0x454   :  { %v565_v5 = vpop.f32.mrf.mxu1 }
 0x455   :  { %v571_v6 = vadd.f32 %v569_v3, %v550_v60 }
 0x456   :  { %v566_v7 = vpop.f32.mrf.mxu1 }
 0x457   :  { %v575_v9 = vmul.f32 %v573_v4, %v571_v6  ;;  %v570_v10 = vmul.f32 0.01, %v566_v7 }
 0x459   :  { %v572_v12 = vadd.f32 %v570_v10, %v555_v62  ;;  %v578_v0 = vadd.f32 %v577_v8, %v575_v9 }
 0x45b   :  { %v576_v15 = vmul.f32 %v574_v11, %v572_v12  ;;  %v580_v16 = vmax.f32 %v578_v0, 0.0 }
 0x45d   :  { %v583_v17 = vmul.f32 %v582_v13, %v580_v16  ;;  %v579_v18 = vadd.f32 %v577_v8, %v576_v15 }
 0x45f   :  { %585 = vadd.xlane.f32.xlu1 %v583_v17  ;;  %v581_v19 = vmax.f32 %v579_v18, 0.0 }
 0x461   :  { %v584_v21 = vmul.f32 %v582_v13, %v581_v19 }
 0x463   :  { %587 = vadd.xlane.f32.xlu0 %v584_v21 }
 0x4e8   :  { %v586_v22 = vpop.xlane.xlu1 %585 }
 0x4e9   :  { %589 = vxpose.xlu1.b32.start [1/2] (short) (narrow) %v586_v22, 8 }
 0x4ec   :  { %v588_v23 = vpop.xlane.xlu0 %587 }
 0x4ed   :  { %590 = vxpose.xlu1.b32.end [2/2] (short) (narrow) %v588_v23, 8 }
 0x565   :  { %v605_v24 = vpop.trf.xlu1 }
 0x566   :  { %622 = vst.msk [vmem:[%s805_s2] sm:$0x1] %vm621_vm11, %v605_v24 }
 0x567   :  { %627 = vsyncpa [#allocation3], 1 }
 0x568   :  { %628 = vsyncpa [#allocation5], 1 }

</bundles_post_ra>
